<compile_context>
chip_gen: v6e
topology: v6e:2x2x1
jax: 0.10.0
libtpu: 0.0.40
codegen_flags: <defaults>
</compile_context>

<pallas_src>
import jax
import jax.numpy as jnp
from jax.experimental import pallas as pl
from jax.experimental.pallas import tpu as pltpu

# ----------------------------------------------------------------------------
# config from GeoModel.py
# ----------------------------------------------------------------------------
CONFIG_RESNET_CONVERT = [[64, 256, 512, 1024, 2048], [128, 256, 512, 512, 512]]
X_SIZE = (256, 256)          # hard-coded in TUN_bone.forward
_BASE_STRIDES = (4, 4, 8, 16, 32)


def _pick_tm(m, cap):
    """Largest tile <= cap that divides m and is a multiple of 8; else full m."""
    t = min(cap, m)
    t -= t % 8
    while t >= 8:
        if m % t == 0:
            return t
        t -= 8
    return m


def _const_spec(shape):
    """BlockSpec for a grid-invariant block: single resident buffer (no
    double-buffering VMEM waste).  Falls back if this JAX version does not
    accept pipeline_mode on BlockSpec."""
    idx = lambda *args: (0,) * len(shape)
    try:
        return pl.BlockSpec(shape, idx, pipeline_mode=pl.Buffered(1))
    except (TypeError, AttributeError):
        return pl.BlockSpec(shape, idx)


# ----------------------------------------------------------------------------
# Pallas kernel 1: fused (3 -> C1 proj + ReLU) then ConvertLayer (C1 -> C2 + ReLU)
# ----------------------------------------------------------------------------
def _fused_proj_convert_kernel(x_ref, w1_ref, b1_ref, w2_ref, b2_ref, o_ref):
    # first 1x1 conv (+bias+ReLU); f32 accumulation
    h = jnp.dot(x_ref[...], w1_ref[...], preferred_element_type=jnp.float32)
    h = jnp.maximum(h + b1_ref[...], 0.0)
    # ConvertLayer 1x1 conv (+bias+ReLU); wide intermediate stays in VMEM,
    # fed to the MXU in bf16 with f32 accumulation.
    y = jnp.dot(h.astype(w2_ref.dtype), w2_ref[...],
                preferred_element_type=jnp.float32)
    y = jnp.maximum(y + b2_ref[...], 0.0)
    o_ref[...] = y.astype(o_ref.dtype)


def fused_proj_convert_pallas(x_nhwc, w1, b1, w2, b2, *, tm_cap):
    """relu(relu(x @ w1 + b1) @ w2 + b2) per pixel — one pallas_call per scale.

    x_nhwc : (B, H, W, 3) f32     w1 : (3, C1)   w2 : (C1, C2)
    returns (B, H, W, C2) bf16
    """
    B, H, W, Cin0 = x_nhwc.shape
    C1 = w1.shape[1]
    C2 = w2.shape[1]
    M = B * H * W
    tm = _pick_tm(M, tm_cap)          # divides M exactly -> no pad / slice

    x2 = x_nhwc.reshape(M, Cin0)                       # tiny (3-ch): keep f32
    w1f = w1.astype(jnp.float32)
    b1r = b1.reshape(1, C1).astype(jnp.float32)
    w2b = w2.astype(jnp.bfloat16)                      # big weight in bf16
    b2r = b2.reshape(1, C2).astype(jnp.float32)

    out = pl.pallas_call(
        _fused_proj_convert_kernel,
        out_shape=jax.ShapeDtypeStruct((M, C2), jnp.bfloat16),
        grid=(M // tm,),
        in_specs=[
            pl.BlockSpec((tm, Cin0), lambda i: (i, 0)),   # pixel tile
            _const_spec((Cin0, C1)),                      # base proj weight
            _const_spec((1, C1)),                         # base proj bias
            _const_spec((C1, C2)),                        # convert weight (bf16)
            _const_spec((1, C2)),                         # convert bias
        ],
        out_specs=pl.BlockSpec((tm, C2), lambda i: (i, 0)),
        compiler_params=pltpu.CompilerParams(dimension_semantics=("parallel",)),
    )(x2, w1f, b1r, w2b, b2r)
    return out.reshape(B, H, W, C2)


# ----------------------------------------------------------------------------
# Pallas kernel 2: merge score head, all three branches in one call.
#   score[i, m] = sum_c (x[i, m, c] + agg[m, c]) * w[c] + b
# The "+ agg" add is folded into the kernel and the 1-channel score is a VPU
# reduction (no 1-column MXU matmul).
# ----------------------------------------------------------------------------
def _score_kernel(x_ref, agg_ref, w_ref, b_ref, o_ref):
    x = x_ref[...].astype(jnp.float32) + agg_ref[...].astype(jnp.float32)
    s = jnp.sum(x * w_ref[...], axis=-1, keepdims=True)   # (tm, 1) via VPU/XLU
    o_ref[...] = (s + b_ref[...]).astype(o_ref.dtype)


def score3_pallas(x3, agg, w, b, *, tm_cap=512):
    """x3: (3, Mb, C) bf16 branch features; agg: (Mb, C) bf16 shared aggregate;
    w: (C, 1), b: (1,).  Returns (3, Mb, 1) f32 scores."""
    _, Mb, C = x3.shape
    tmb = _pick_tm(Mb, tm_cap)
    wr = w.reshape(1, C).astype(jnp.float32)
    br = b.reshape(1, 1).astype(jnp.float32)
    # TODO(synk): for very large Mb, repack the (.,1) output into 128-pixel
    # lanes for fully lane-dense stores; at these sizes the store volume is tiny.
    out = pl.pallas_call(
        _score_kernel,
        out_shape=jax.ShapeDtypeStruct((3, Mb, 1), jnp.float32),
        grid=(3, Mb // tmb),
        in_specs=[
            pl.BlockSpec((None, tmb, C), lambda i, j: (i, j, 0)),  # branch tile
            pl.BlockSpec((tmb, C), lambda i, j: (j, 0)),           # aggregate
            _const_spec((1, C)),                                   # score weight
            _const_spec((1, 1)),                                   # score bias
        ],
        out_specs=pl.BlockSpec((None, tmb, 1), lambda i, j: (i, j, 0)),
        compiler_params=pltpu.CompilerParams(
            dimension_semantics=("parallel", "parallel")),
    )(x3, agg, wr, br)
    return out


# ----------------------------------------------------------------------------
# deterministic parameter init (synthetic; no checkpoint load)
# ----------------------------------------------------------------------------
def _init_conv(key, cin, cout):
    kw, kb = jax.random.split(key)
    std = (2.0 / cin) ** 0.5
    w = jax.random.normal(kw, (cin, cout), jnp.float32) * std
    b = 0.01 * jax.random.normal(kb, (cout,), jnp.float32)
    return w, b


def init_params(key):
    in_ch, out_ch = CONFIG_RESNET_CONVERT
    keys = jax.random.split(key, 2 * len(in_ch) + 1)
    return {
        # stand-in ResNet "base": one 3 -> C_i projection per scale
        "base": [_init_conv(keys[i], 3, c) for i, c in enumerate(in_ch)],
        # ConvertLayer: 1x1 conv (C_in_i -> C_out_i) + ReLU, as in GeoModel.py
        "convert": [
            _init_conv(keys[len(in_ch) + i], ci, co)
            for i, (ci, co) in enumerate(zip(in_ch, out_ch))
        ],
        # stand-in merge1 score head: 128 -> 1
        "score": _init_conv(keys[-1], out_ch[0], 1),
    }


# ----------------------------------------------------------------------------
# stand-in base + ConvertLayer, fused, over the stacked 12-image batch
# ----------------------------------------------------------------------------
# TODO(synk): real `base` is an external ResNet-50 truncation; stand-in =
# strided average pooling + 1x1 projection to the expected channel dims.
def base_convert_forward(params, x_nchw_batched):
    x = jnp.transpose(x_nchw_batched, (0, 2, 3, 1))   # NCHW -> NHWC
    B, H, W, C = x.shape
    feats = []
    for (w1, b1), (w2, b2), s in zip(params["base"], params["convert"],
                                     _BASE_STRIDES):
        pooled = x.reshape(B, H // s, s, W // s, s, C).mean(axis=(2, 4))
        cin = w2.shape[0]
        tm_cap = 512 if cin <= 512 else 256   # bound VMEM at the deep scales
        feats.append(
            fused_proj_convert_pallas(pooled, w1, b1, w2, b2, tm_cap=tm_cap))
    return feats   # 5-scale NHWC pyramid (bf16), channels [128,256,512,512,512]


# ----------------------------------------------------------------------------
# stand-in merge1 (injected module, architecture not defined in file)
# ----------------------------------------------------------------------------
def _upsample_nearest_to(x_nhwc, size_hw):
    N, H, W, C = x_nhwc.shape
    fh, fw = size_hw[0] // H, size_hw[1] // W
    return jnp.repeat(jnp.repeat(x_nhwc, fh, axis=1), fw, axis=2)


# TODO(synk): real `merge1_layers` is an external deep fusion module; stand-in
# aggregates the finest converted features of the 9 auxiliary inputs, scores
# each of the three main branches (+aggregate) with the Pallas score kernel,
# then nearest-upsamples to x_size as the real module would.
def merge1_forward(params, feats_finest, n_per_input, x_size):
    ws, bs = params["score"]
    B, h, w, C = feats_finest.shape          # B = 12 * n
    n = n_per_input
    Mb = n * h * w
    agg = (feats_finest[3 * n:].astype(jnp.float32)
           .reshape(9, n, h, w, C).sum(axis=0))               # (n, h, w, C)
    branches = feats_finest[:3 * n].reshape(3, Mb, C).astype(jnp.bfloat16)
    aggf = agg.reshape(Mb, C).astype(jnp.bfloat16)
    scores = score3_pallas(branches, aggf, ws, bs)            # (3, Mb, 1) f32
    outs = []
    for i in range(3):
        sc = scores[i].reshape(n, h, w, 1)
        up = _upsample_nearest_to(sc, x_size)                 # (n, 256, 256, 1)
        outs.append(jnp.transpose(up, (0, 3, 1, 2)))          # back to NCHW
    return tuple(outs)


# ----------------------------------------------------------------------------
# TUN_bone forward
# ----------------------------------------------------------------------------
def tun_bone_forward(params, x1_ori, x1_mid, x1_sml,
                     x2, x3, x4, x5, x6, x7, x8, x9, x10,
                     base_model_cfg="resnet"):
    if base_model_cfg != "resnet":
        raise NotImplementedError("TUN_bone is only constructed for 'resnet'")
    x_size = X_SIZE
    inputs = [x1_ori, x1_mid, x1_sml, x2, x3, x4, x5, x6, x7, x8, x9, x10]
    n = x1_ori.shape[0]
    # Batch the 12 base/convert passes into ONE stacked batch per scale.
    stacked = jnp.concatenate(inputs, axis=0)                 # (12n, 3, H, W)
    feats = base_convert_forward(params, stacked)             # 5-scale pyramid
    up_x1, up_x2, up_x3 = merge1_forward(params, feats[0], n, x_size)
    return up_x1, up_x2, up_x3


# ----------------------------------------------------------------------------
# main
# ----------------------------------------------------------------------------
if __name__ == "__main__":
    key = jax.random.PRNGKey(0)
    pkey, dkey = jax.random.split(key)
    params = init_params(pkey)

    # 12 NCHW input images, small spatial size (deepest base stride is 32).
    N, C, H, W = 1, 3, 32, 32
    ikeys = jax.random.split(dkey, 12)
    xs = [jax.random.normal(k, (N, C, H, W), jnp.float32) for k in ikeys]

    fwd = jax.jit(tun_bone_forward)
    up_x1, up_x2, up_x3 = fwd(params, *xs)
    jax.block_until_ready((up_x1, up_x2, up_x3))

    assert up_x1.shape == (N, 1, 256, 256)
    assert up_x2.shape == (N, 1, 256, 256)
    assert up_x3.shape == (N, 1, 256, 256)
    print("KERNEL_OK")
</pallas_src>

<mosaic_0001>
module attributes {stable_mosaic.version = 11 : i64} {
  func.func @_fused_proj_convert_kernel(%arg0: i32, %arg1: memref<384x3xf32, #tpu.memory_space<vmem>>, %arg2: memref<3x64xf32, #tpu.memory_space<vmem>>, %arg3: memref<1x64xf32, #tpu.memory_space<vmem>>, %arg4: memref<64x128xbf16, #tpu.memory_space<vmem>>, %arg5: memref<1x128xf32, #tpu.memory_space<vmem>>, %arg6: memref<384x128xbf16, #tpu.memory_space<vmem>>) attributes {dimension_semantics = [#tpu.dimension_semantics<parallel>], iteration_bounds = array<i64: 2>, scalar_prefetch = 0 : i64, scratch_operands = 0 : i64, tpu.core_type = #tpu.core_type<tc>, window_params = [{transform_indices = @transform_0, window_bounds = array<i64: 384, 3>}, {pipeline_mode = #tpu.pipeline_mode<synchronous>, transform_indices = @transform_1, window_bounds = array<i64: 3, 64>}, {pipeline_mode = #tpu.pipeline_mode<synchronous>, transform_indices = @transform_2, window_bounds = array<i64: 1, 64>}, {pipeline_mode = #tpu.pipeline_mode<synchronous>, transform_indices = @transform_3, window_bounds = array<i64: 64, 128>}, {pipeline_mode = #tpu.pipeline_mode<synchronous>, transform_indices = @transform_4, window_bounds = array<i64: 1, 128>}, {transform_indices = @transform_5, window_bounds = array<i64: 384, 128>}]} {
    %c0 = arith.constant 0 : index
    %c0_0 = arith.constant 0 : index
    %0 = vector.load %arg1[%c0, %c0_0] : memref<384x3xf32, #tpu.memory_space<vmem>>, vector<384x3xf32>
    %c0_1 = arith.constant 0 : index
    %c0_2 = arith.constant 0 : index
    %1 = vector.load %arg2[%c0_1, %c0_2] : memref<3x64xf32, #tpu.memory_space<vmem>>, vector<3x64xf32>
    %cst = arith.constant dense<0.000000e+00> : vector<384x64xf32>
    %2 = tpu.matmul %0, %1, %cst {dimension_numbers = #tpu.dot_dimension_numbers<[1], [0], [0], [1], [0, 0, 1, 1], [], []>} : vector<384x3xf32>, vector<3x64xf32>, vector<384x64xf32> -> vector<384x64xf32>
    %c0_3 = arith.constant 0 : index
    %c0_4 = arith.constant 0 : index
    %3 = vector.load %arg3[%c0_3, %c0_4] : memref<1x64xf32, #tpu.memory_space<vmem>>, vector<1x64xf32>
    %4 = vector.broadcast %3 : vector<1x64xf32> to vector<384x64xf32>
    %5 = arith.addf %2, %4 : vector<384x64xf32>
    %cst_5 = arith.constant 0.000000e+00 : f32
    %6 = vector.broadcast %cst_5 : f32 to vector<384x64xf32>
    %7 = arith.maximumf %5, %6 : vector<384x64xf32>
    %8 = arith.truncf %7 : vector<384x64xf32> to vector<384x64xbf16>
    %c0_6 = arith.constant 0 : index
    %c0_7 = arith.constant 0 : index
    %9 = vector.load %arg4[%c0_6, %c0_7] : memref<64x128xbf16, #tpu.memory_space<vmem>>, vector<64x128xbf16>
    %cst_8 = arith.constant dense<0.000000e+00> : vector<384x128xf32>
    %10 = tpu.matmul %8, %9, %cst_8 {dimension_numbers = #tpu.dot_dimension_numbers<[1], [0], [0], [1], [0, 0, 1, 1], [], []>} : vector<384x64xbf16>, vector<64x128xbf16>, vector<384x128xf32> -> vector<384x128xf32>
    %c0_9 = arith.constant 0 : index
    %c0_10 = arith.constant 0 : index
    %11 = vector.load %arg5[%c0_9, %c0_10] : memref<1x128xf32, #tpu.memory_space<vmem>>, vector<1x128xf32>
    %12 = vector.broadcast %11 : vector<1x128xf32> to vector<384x128xf32>
    %13 = arith.addf %10, %12 : vector<384x128xf32>
    %cst_11 = arith.constant 0.000000e+00 : f32
    %14 = vector.broadcast %cst_11 : f32 to vector<384x128xf32>
    %15 = arith.maximumf %13, %14 : vector<384x128xf32>
    %16 = arith.truncf %15 : vector<384x128xf32> to vector<384x128xbf16>
    %c0_12 = arith.constant 0 : index
    %c0_13 = arith.constant 0 : index
    %17 = vector.load %arg6[%c0_12, %c0_13] : memref<384x128xbf16, #tpu.memory_space<vmem>>, vector<384x128xbf16>
    tpu.vector_store %arg6[%c0_12, %c0_13], %16 {strides = array<i32>} : memref<384x128xbf16, #tpu.memory_space<vmem>>, vector<384x128xbf16>,
    return
  }
  func.func @transform_0(%arg0: i32) -> (i32, i32) {
    %c0_i32 = arith.constant 0 : i32
    %c0_i32_0 = arith.constant 0 : i32
    return %arg0, %c0_i32 : i32, i32
  }
  func.func @transform_1(%arg0: i32) -> (i32, i32) {
    %c0_i32 = arith.constant 0 : i32
    %c0_i32_0 = arith.constant 0 : i32
    %c0_i32_1 = arith.constant 0 : i32
    return %c0_i32, %c0_i32_0 : i32, i32
  }
  func.func @transform_2(%arg0: i32) -> (i32, i32) {
    %c0_i32 = arith.constant 0 : i32
    %c0_i32_0 = arith.constant 0 : i32
    %c0_i32_1 = arith.constant 0 : i32
    return %c0_i32, %c0_i32_0 : i32, i32
  }
  func.func @transform_3(%arg0: i32) -> (i32, i32) {
    %c0_i32 = arith.constant 0 : i32
    %c0_i32_0 = arith.constant 0 : i32
    %c0_i32_1 = arith.constant 0 : i32
    return %c0_i32, %c0_i32_0 : i32, i32
  }
  func.func @transform_4(%arg0: i32) -> (i32, i32) {
    %c0_i32 = arith.constant 0 : i32
    %c0_i32_0 = arith.constant 0 : i32
    %c0_i32_1 = arith.constant 0 : i32
    return %c0_i32, %c0_i32_0 : i32, i32
  }
  func.func @transform_5(%arg0: i32) -> (i32, i32) {
    %c0_i32 = arith.constant 0 : i32
    %c0_i32_0 = arith.constant 0 : i32
    return %arg0, %c0_i32 : i32, i32
  }
}

module attributes {stable_mosaic.version = 11 : i64} {
  func.func @_score_kernel(%arg0: i32, %arg1: i32, %arg2: memref<1x64x128xbf16, #tpu.memory_space<vmem>>, %arg3: memref<64x128xbf16, #tpu.memory_space<vmem>>, %arg4: memref<1x128xf32, #tpu.memory_space<vmem>>, %arg5: memref<1x1xf32, #tpu.memory_space<vmem>>, %arg6: memref<1x64x1xf32, #tpu.memory_space<vmem>>) attributes {dimension_semantics = [#tpu.dimension_semantics<parallel>, #tpu.dimension_semantics<parallel>], iteration_bounds = array<i64: 3, 1>, scalar_prefetch = 0 : i64, scratch_operands = 0 : i64, tpu.core_type = #tpu.core_type<tc>, window_params = [{transform_indices = @transform_0, window_bounds = array<i64: 1, 64, 128>}, {transform_indices = @transform_1, window_bounds = array<i64: 64, 128>}, {pipeline_mode = #tpu.pipeline_mode<synchronous>, transform_indices = @transform_2, window_bounds = array<i64: 1, 128>}, {pipeline_mode = #tpu.pipeline_mode<synchronous>, transform_indices = @transform_3, window_bounds = array<i64: 1, 1>}, {transform_indices = @transform_4, window_bounds = array<i64: 1, 64, 1>}]} {
    %c0 = arith.constant 0 : index
    %c0_0 = arith.constant 0 : index
    %c0_1 = arith.constant 0 : index
    %0 = vector.load %arg2[%c0, %c0_0, %c0_1] : memref<1x64x128xbf16, #tpu.memory_space<vmem>>, vector<1x64x128xbf16>
    %1 = vector.shape_cast %0 : vector<1x64x128xbf16> to vector<64x128xbf16>
    %2 = arith.extf %1 : vector<64x128xbf16> to vector<64x128xf32>
    %c0_2 = arith.constant 0 : index
    %c0_3 = arith.constant 0 : index
    %3 = vector.load %arg3[%c0_2, %c0_3] : memref<64x128xbf16, #tpu.memory_space<vmem>>, vector<64x128xbf16>
    %4 = arith.extf %3 : vector<64x128xbf16> to vector<64x128xf32>
    %5 = arith.addf %2, %4 : vector<64x128xf32>
    %c0_4 = arith.constant 0 : index
    %c0_5 = arith.constant 0 : index
    %6 = vector.load %arg4[%c0_4, %c0_5] : memref<1x128xf32, #tpu.memory_space<vmem>>, vector<1x128xf32>
    %7 = vector.broadcast %6 : vector<1x128xf32> to vector<64x128xf32>
    %8 = arith.mulf %5, %7 : vector<64x128xf32>
    %cst = arith.constant dense<0.000000e+00> : vector<64xf32>
    %9 = vector.multi_reduction <add>, %8, %cst [1] : vector<64x128xf32> to vector<64xf32>
    %10 = vector.shape_cast %9 : vector<64xf32> to vector<64x1xf32>
    %c0_6 = arith.constant 0 : index
    %c0_7 = arith.constant 0 : index
    %11 = vector.load %arg5[%c0_6, %c0_7] : memref<1x1xf32, #tpu.memory_space<vmem>>, vector<1x1xf32>
    %12 = vector.broadcast %11 : vector<1x1xf32> to vector<64x1xf32>
    %13 = arith.addf %10, %12 : vector<64x1xf32>
    %c0_8 = arith.constant 0 : index
    %c0_9 = arith.constant 0 : index
    %c0_10 = arith.constant 0 : index
    %14 = vector.load %arg6[%c0_8, %c0_9, %c0_10] : memref<1x64x1xf32, #tpu.memory_space<vmem>>, vector<1x64x1xf32>
    %15 = vector.shape_cast %14 : vector<1x64x1xf32> to vector<64x1xf32>
    %16 = vector.shape_cast %13 : vector<64x1xf32> to vector<1x64x1xf32>
    tpu.vector_store %arg6[%c0_8, %c0_9, %c0_10], %16 {strides = array<i32>} : memref<1x64x1xf32, #tpu.memory_space<vmem>>, vector<1x64x1xf32>,
    return
  }
  func.func @transform_0(%arg0: i32, %arg1: i32) -> (i32, i32, i32) {
    %c0_i32 = arith.constant 0 : i32
    %c0_i32_0 = arith.constant 0 : i32
    return %arg0, %arg1, %c0_i32 : i32, i32, i32
  }
  func.func @transform_1(%arg0: i32, %arg1: i32) -> (i32, i32) {
    %c0_i32 = arith.constant 0 : i32
    %c0_i32_0 = arith.constant 0 : i32
    return %arg1, %c0_i32 : i32, i32
  }
  func.func @transform_2(%arg0: i32, %arg1: i32) -> (i32, i32) {
    %c0_i32 = arith.constant 0 : i32
    %c0_i32_0 = arith.constant 0 : i32
    %c0_i32_1 = arith.constant 0 : i32
    return %c0_i32, %c0_i32_0 : i32, i32
  }
  func.func @transform_3(%arg0: i32, %arg1: i32) -> (i32, i32) {
    %c0_i32 = arith.constant 0 : i32
    %c0_i32_0 = arith.constant 0 : i32
    %c0_i32_1 = arith.constant 0 : i32
    return %c0_i32, %c0_i32_0 : i32, i32
  }
  func.func @transform_4(%arg0: i32, %arg1: i32) -> (i32, i32, i32) {
    %c0_i32 = arith.constant 0 : i32
    %c0_i32_0 = arith.constant 0 : i32
    return %arg0, %arg1, %c0_i32 : i32, i32, i32
  }
}

</mosaic_0001>

<bundles_post_ra>
// kernel: tun_bone_forward.2
= control target key start
LH: loop header
LB: loop body
LE: loop exit
PB: predicated region body
PF: predicated region fallthrough
CT: control target
= control target key end

     0   :  { %s2076_s18 = smov 0   ;;  %s2366_s0 = inlined_call_operand.vmem [shape: f32[768,3], index: 0, kind: input, shape index: {}]   ;;  %s2367_s1 = inlined_call_operand.vmem [shape: f32[3,64], index: 1, kind: input, shape index: {}]   ;;  %s2368_s2 = inlined_call_operand.vmem [shape: f32[1,64], index: 2, kind: input, shape index: {}]   ;;  %s2369_s3 = inlined_call_operand.vmem [shape: bf16[64,128], index: 3, kind: input, shape index: {}]   ;;  %s2370_s4 = inlined_call_operand.vmem [shape: f32[1,128], index: 4, kind: input, shape index: {}]   ;;  %s2371_s5 = inlined_call_operand.vmem [shape: bf16[768,128], index: 5, kind: output, shape index: {}]  }
   0x1 LB: > { %s1492_s19 = sadd.s32 4294967295, %s2044_s18   ;;  %p1496_p0 = scmp.ge.s32.totalorder %s2044_s18, 1  ;;  %s2044_s18 = sphi %s2076_s18, %s15_s18  }
   0x2   : > { %p188_p1 = scmp.lt.s32.totalorder %s2044_s18, 3 }
   0x4   : > { %p189_p2 = pnand %p1496_p0, %p188_p1 }
   0x5   : > { %s216_s22 = smul.u32 (!%p189_p2), 48, %s1492_s19 }
   0x6   : > { %192 = sbr.rel (%p189_p2) target bundleno = 515 (0x203), region = 40 }
   0x7   : > { %p217_p3 = scmp.lt.s32.totalorder (!%p189_p2), %s216_s22, 95 }
   0xb   : > { %v277_v0 = vld [vmem:[%s2367_s1] sm:$0x7]  ;;  %vm430_vm0 = vcmask 1042432   ;;  %v2034_v1 = vld [vmem:[%s2369_s3 + $0x18] sm:$0xff]   ;;  %s2373_s22 = smov (!%p217_p3, %s216_s22), 95  ;;  %vm285_vm1 = vcmask 23552  }
   0xc   : > { %1896 = vmatprep.subr.msk.mxu0 %vm430_vm0, %v277_v0  ;;  %1970 = vmatprep.subr.bf16.mxu1 %v2034_v1  ;;  %s1497_s25 = sshll.u32 %s2373_s22, 3  ;;  %v2035_v37 = vld [vmem:[%s2369_s3 + $0x10] sm:$0xff]   ;;  %v2036_v40 = vld [vmem:[%s2369_s3 + $0x8] sm:$0xff]   ;;  %v2037_v43 = vld [vmem:[%s2369_s3] sm:$0xff]   ;;  %vm850_vm2 = vcmask 523264   ;;  %s1498_s14 = sshll.u32 %s2373_s22, 2 }
   0xd   : > { %1897 = vmatpush3.msk.msra.mxu0 %vm430_vm0, %v277_v0  ;;  %1971 = vmatpush3.bf16.msra.mxu1 %v2034_v1  ;;  %s2096_s28 = scalar_lea.vmem %s2366_s0, %s1497_s25  ;;  %v2206_v53 = vld [vmem:[%s2368_s2] ss:$0 sm:$0xff]  ;;  %s2293_s17 = scalar_lea.vmem %s2371_s5, %s1498_s14 }
   0xe   : > { %v229_v2 = vld [vmem:[%s2096_s28] sm:$0xff]  ;;  %v230_v3 = vld [vmem:[%s2096_s28 + $0x8] sm:$0xff]  ;;  %v231_v4 = vld [vmem:[%s2096_s28 + $0x10] sm:$0xff]  ;;  %1972 = vmatprep.subr.bf16.mxu1 %v2035_v37 }
   0xf   : > { %1898 = vmatprep.mubr.msk.f32.mxu0 %vm285_vm1, %v229_v2  ;;  %v232_v5 = vld [vmem:[%s2096_s28 + $0x18] sm:$0xff]  ;;  %v233_v6 = vld [vmem:[%s2096_s28 + $0x20] sm:$0xff]  ;;  %v234_v7 = vld [vmem:[%s2096_s28 + $0x28] sm:$0xff] }
  0x10   : > { %1899 = vmatmul.mubr.msk.f32.vlgmr.msra.gmra.mxu0 %vm285_vm1, %v230_v3  ;;  %v235_v8 = vld [vmem:[%s2096_s28 + $0x30] sm:$0xff]  ;;  %v236_v9 = vld [vmem:[%s2096_s28 + $0x38] sm:$0xff]  ;;  %v237_v10 = vld [vmem:[%s2096_s28 + $0x40] sm:$0xff] }
  0x11   : > { %1901 = vmatprep.mubr.msk.f32.mxu0 %vm285_vm1, %v231_v4  ;;  %v238_v11 = vld [vmem:[%s2096_s28 + $0x48] sm:$0xff]  ;;  %v239_v12 = vld [vmem:[%s2096_s28 + $0x50] sm:$0xff]  ;;  %v240_v13 = vld [vmem:[%s2096_s28 + $0x58] sm:$0xff]  ;;  %1973 = vmatpush3.bf16.msra.mxu1 %v2035_v37 }
  0x12   : > { %v241_v14 = vld [vmem:[%s2096_s28 + $0x60] sm:$0xff]  ;;  %v242_v15 = vld [vmem:[%s2096_s28 + $0x68] sm:$0xff]  ;;  %v243_v16 = vld [vmem:[%s2096_s28 + $0x70] sm:$0xff]  ;;  %1974 = vmatprep.subr.bf16.mxu1 %v2036_v40 }
  0x13   : > { %v244_v17 = vld [vmem:[%s2096_s28 + $0x78] sm:$0xff]  ;;  %v245_v18 = vld [vmem:[%s2096_s28 + $0x80] sm:$0xff]  ;;  %v246_v19 = vld [vmem:[%s2096_s28 + $0x88] sm:$0xff] }
  0x14   : > { %1902 = vmatmul.mubr.msk.f32.gmra.mxu0 %vm285_vm1, %v232_v5  ;;  %v247_v20 = vld [vmem:[%s2096_s28 + $0x90] sm:$0xff]  ;;  %v248_v21 = vld [vmem:[%s2096_s28 + $0x98] sm:$0xff]  ;;  %v249_v22 = vld [vmem:[%s2096_s28 + $0xa0] sm:$0xff] }
  0x15   : > { %1904 = vmatprep.mubr.msk.f32.mxu0 %vm285_vm1, %v233_v6  ;;  %v250_v23 = vld [vmem:[%s2096_s28 + $0xa8] sm:$0xff]  ;;  %v251_v24 = vld [vmem:[%s2096_s28 + $0xb0] sm:$0xff]  ;;  %v252_v25 = vld [vmem:[%s2096_s28 + $0xb8] sm:$0xff]  ;;  %1975 = vmatpush3.bf16.msra.mxu1 %v2036_v40 }
  0x16   : > { %v253_v26 = vld [vmem:[%s2096_s28 + $0xc0] sm:$0xff]  ;;  %v254_v27 = vld [vmem:[%s2096_s28 + $0xc8] sm:$0xff]  ;;  %v255_v28 = vld [vmem:[%s2096_s28 + $0xd0] sm:$0xff]  ;;  %1976 = vmatprep.subr.bf16.mxu1 %v2037_v43 }
  0x17   : > { %v256_v29 = vld [vmem:[%s2096_s28 + $0xd8] sm:$0xff]  ;;  %v257_v30 = vld [vmem:[%s2096_s28 + $0xe0] sm:$0xff]  ;;  %v258_v31 = vld [vmem:[%s2096_s28 + $0xe8] sm:$0xff] }
  0x18   : > { %1905 = vmatmul.mubr.msk.f32.gmra.mxu0 %vm285_vm1, %v234_v7  ;;  %v259_v32 = vld [vmem:[%s2096_s28 + $0xf0] sm:$0xff]  ;;  %v260_v33 = vld [vmem:[%s2096_s28 + $0xf8] sm:$0xff]  ;;  %v261_v34 = vld [vmem:[%s2096_s28 + $0x100] sm:$0xff] }
  0x19   : > { %1907 = vmatprep.mubr.msk.f32.mxu0 %vm285_vm1, %v235_v8  ;;  %v262_v35 = vld [vmem:[%s2096_s28 + $0x108] sm:$0xff]  ;;  %v263_v36 = vld [vmem:[%s2096_s28 + $0x110] sm:$0xff]  ;;  %v264_v38 = vld [vmem:[%s2096_s28 + $0x118] sm:$0xff]  ;;  %1977 = vmatpush3.bf16.msra.mxu1 %v2037_v43 }
  0x1a   : > { %v265_v39 = vld [vmem:[%s2096_s28 + $0x120] sm:$0xff]  ;;  %v266_v41 = vld [vmem:[%s2096_s28 + $0x128] sm:$0xff]  ;;  %v267_v42 = vld [vmem:[%s2096_s28 + $0x130] sm:$0xff] }
  0x1b   : > { %v268_v44 = vld [vmem:[%s2096_s28 + $0x138] sm:$0xff]  ;;  %v269_v45 = vld [vmem:[%s2096_s28 + $0x140] sm:$0xff]  ;;  %v270_v46 = vld [vmem:[%s2096_s28 + $0x148] sm:$0xff] }
  0x1c   : > { %1908 = vmatmul.mubr.msk.f32.gmra.mxu0 %vm285_vm1, %v236_v9  ;;  %v271_v47 = vld [vmem:[%s2096_s28 + $0x150] sm:$0xff]  ;;  %v272_v48 = vld [vmem:[%s2096_s28 + $0x158] sm:$0xff]  ;;  %v273_v49 = vld [vmem:[%s2096_s28 + $0x160] sm:$0xff] }
  0x1d   : > { %1910 = vmatprep.mubr.msk.f32.mxu0 %vm285_vm1, %v237_v10  ;;  %v274_v50 = vld [vmem:[%s2096_s28 + $0x168] sm:$0xff]  ;;  %v275_v51 = vld [vmem:[%s2096_s28 + $0x170] sm:$0xff]  ;;  %v276_v52 = vld [vmem:[%s2096_s28 + $0x178] sm:$0xff] }
  0x20   : > { %1911 = vmatmul.mubr.msk.f32.gmra.mxu0 %vm285_vm1, %v238_v11 }
  0x21   : > { %1913 = vmatprep.mubr.msk.f32.mxu0 %vm285_vm1, %v239_v12 }
  0x24   : > { %1914 = vmatmul.mubr.msk.f32.gmra.mxu0 %vm285_vm1, %v240_v13 }
  0x25   : > { %1916 = vmatprep.mubr.msk.f32.mxu0 %vm285_vm1, %v241_v14 }
  0x28   : > { %1917 = vmatmul.mubr.msk.f32.gmra.mxu0 %vm285_vm1, %v242_v15 }
  0x29   : > { %1919 = vmatprep.mubr.msk.f32.mxu0 %vm285_vm1, %v243_v16 }
  0x2c   : > { %1920 = vmatmul.mubr.msk.f32.gmra.mxu0 %vm285_vm1, %v244_v17 }
  0x2d   : > { %1922 = vmatprep.mubr.msk.f32.mxu0 %vm285_vm1, %v245_v18 }
  0x30   : > { %1923 = vmatmul.mubr.msk.f32.gmra.mxu0 %vm285_vm1, %v246_v19 }
  0x31   : > { %1925 = vmatprep.mubr.msk.f32.mxu0 %vm285_vm1, %v247_v20 }
  0x34   : > { %1926 = vmatmul.mubr.msk.f32.gmra.mxu0 %vm285_vm1, %v248_v21 }
  0x35   : > { %1928 = vmatprep.mubr.msk.f32.mxu0 %vm285_vm1, %v249_v22 }
  0x38   : > { %1929 = vmatmul.mubr.msk.f32.gmra.mxu0 %vm285_vm1, %v250_v23 }
  0x39   : > { %1931 = vmatprep.mubr.msk.f32.mxu0 %vm285_vm1, %v251_v24 }
  0x3c   : > { %1932 = vmatmul.mubr.msk.f32.gmra.mxu0 %vm285_vm1, %v252_v25 }
  0x3d   : > { %1934 = vmatprep.mubr.msk.f32.mxu0 %vm285_vm1, %v253_v26 }
  0x40   : > { %1935 = vmatmul.mubr.msk.f32.gmra.mxu0 %vm285_vm1, %v254_v27 }
  0x41   : > { %1937 = vmatprep.mubr.msk.f32.mxu0 %vm285_vm1, %v255_v28 }
  0x44   : > { %1938 = vmatmul.mubr.msk.f32.gmra.mxu0 %vm285_vm1, %v256_v29 }
  0x45   : > { %1940 = vmatprep.mubr.msk.f32.mxu0 %vm285_vm1, %v257_v30 }
  0x48   : > { %1941 = vmatmul.mubr.msk.f32.gmra.mxu0 %vm285_vm1, %v258_v31 }
  0x49   : > { %1943 = vmatprep.mubr.msk.f32.mxu0 %vm285_vm1, %v259_v32 }
  0x4c   : > { %1944 = vmatmul.mubr.msk.f32.gmra.mxu0 %vm285_vm1, %v260_v33 }
  0x4d   : > { %1946 = vmatprep.mubr.msk.f32.mxu0 %vm285_vm1, %v261_v34 }
  0x50   : > { %1947 = vmatmul.mubr.msk.f32.gmra.mxu0 %vm285_vm1, %v262_v35 }
  0x51   : > { %1949 = vmatprep.mubr.msk.f32.mxu0 %vm285_vm1, %v263_v36 }
  0x54   : > { %1950 = vmatmul.mubr.msk.f32.gmra.mxu0 %vm285_vm1, %v264_v38 }
  0x55   : > { %1952 = vmatprep.mubr.msk.f32.mxu0 %vm285_vm1, %v265_v39 }
  0x58   : > { %1953 = vmatmul.mubr.msk.f32.gmra.mxu0 %vm285_vm1, %v266_v41 }
  0x59   : > { %1955 = vmatprep.mubr.msk.f32.mxu0 %vm285_vm1, %v267_v42 }
  0x5c   : > { %1956 = vmatmul.mubr.msk.f32.gmra.mxu0 %vm285_vm1, %v268_v44 }
  0x5d   : > { %1958 = vmatprep.mubr.msk.f32.mxu0 %vm285_vm1, %v269_v45 }
  0x60   : > { %1959 = vmatmul.mubr.msk.f32.gmra.mxu0 %vm285_vm1, %v270_v46 }
  0x61   : > { %1961 = vmatprep.mubr.msk.f32.mxu0 %vm285_vm1, %v271_v47 }
  0x64   : > { %1962 = vmatmul.mubr.msk.f32.gmra.mxu0 %vm285_vm1, %v272_v48 }
  0x65   : > { %1964 = vmatprep.mubr.msk.f32.mxu0 %vm285_vm1, %v273_v49 }
  0x68   : > { %1965 = vmatmul.mubr.msk.f32.gmra.mxu0 %vm285_vm1, %v274_v50 }
  0x69   : > { %1967 = vmatprep.mubr.msk.f32.mxu0 %vm285_vm1, %v275_v51 }
  0x6c   : > { %1968 = vmatmul.mubr.msk.f32.gmra.mxu0 %vm285_vm1, %v276_v52 }
  0xd0   : > { %v1900_v54 = vpop.f32.mrf.mxu0 }
  0xd1   : > { %v506_v55 = vadd.f32 %v1900_v54, %v2206_v53 }
  0xd2   : > { %v500_v56 = vpop.f32.mrf.mxu0 }
  0xd3   : > { %v501_v57 = vadd.f32 %v2206_v53, %v500_v56  ;;  %v740_v59 = vmax.f32 %v506_v55, 0.0 }
  0xd4   : > { %v1903_v58 = vpop.f32.mrf.mxu0 }
  0xd5   : > { %v739_v60 = vmax.f32 %v501_v57, 0.0  ;;  %v516_v61 = vadd.f32 %v1903_v58, %v2206_v53 }
  0xd6   : > { %v510_v62 = vpop.f32.mrf.mxu0 }
  0xd7   : > { %v511_v63 = vadd.f32 %v2206_v53, %v510_v62  ;;  %v787_v0 = vpack.c.bf16 %v740_v59, %v739_v60  ;;  %v742_v2 = vmax.f32 %v516_v61, 0.0 }
  0xd8   : > { %v1906_v1 = vpop.f32.mrf.mxu0 }
  0xd9   : > { %v741_v3 = vmax.f32 %v511_v63, 0.0  ;;  %v526_v4 = vadd.f32 %v1906_v1, %v2206_v53  ;;  %1978 = vmatprep.mubr.msk.bf16.mxu1 %vm850_vm2, %v787_v0 }
  0xda   : > { %v520_v5 = vpop.f32.mrf.mxu0 }
  0xdb   : > { %v788_v6 = vpack.c.bf16 %v742_v2, %v741_v3  ;;  %v521_v7 = vadd.f32 %v2206_v53, %v520_v5  ;;  %v744_v9 = vmax.f32 %v526_v4, 0.0 }
  0xdc   : > { %v1909_v8 = vpop.f32.mrf.mxu0 }
  0xdd   : > { %v743_v10 = vmax.f32 %v521_v7, 0.0  ;;  %v536_v11 = vadd.f32 %v1909_v8, %v2206_v53  ;;  %1979 = vmatmul.mubr.msk.bf16.vlgmr.msra.gmra.mxu1 %vm850_vm2, %v788_v6 }
  0xde   : > { %v530_v12 = vpop.f32.mrf.mxu0 }
  0xdf   : > { %v789_v13 = vpack.c.bf16 %v744_v9, %v743_v10  ;;  %v531_v14 = vadd.f32 %v2206_v53, %v530_v12  ;;  %v746_v16 = vmax.f32 %v536_v11, 0.0 }
  0xe0   : > { %v1912_v15 = vpop.f32.mrf.mxu0 }
  0xe1   : > { %v745_v17 = vmax.f32 %v531_v14, 0.0  ;;  %v546_v18 = vadd.f32 %v1912_v15, %v2206_v53  ;;  %1982 = vmatprep.mubr.msk.bf16.mxu1 %vm850_vm2, %v789_v13 }
  0xe2   : > { %v540_v19 = vpop.f32.mrf.mxu0 }
  0xe3   : > { %v790_v20 = vpack.c.bf16 %v746_v16, %v745_v17  ;;  %v541_v21 = vadd.f32 %v2206_v53, %v540_v19  ;;  %v748_v23 = vmax.f32 %v546_v18, 0.0 }
  0xe4   : > { %v1915_v22 = vpop.f32.mrf.mxu0 }
  0xe5   : > { %v747_v24 = vmax.f32 %v541_v21, 0.0  ;;  %v556_v25 = vadd.f32 %v1915_v22, %v2206_v53  ;;  %1983 = vmatmul.mubr.msk.bf16.gmra.mxu1 %vm850_vm2, %v790_v20 }
  0xe6   : > { %v550_v26 = vpop.f32.mrf.mxu0 }
  0xe7   : > { %v791_v27 = vpack.c.bf16 %v748_v23, %v747_v24  ;;  %v551_v28 = vadd.f32 %v2206_v53, %v550_v26  ;;  %v750_v30 = vmax.f32 %v556_v25, 0.0 }
  0xe8   : > { %v1918_v29 = vpop.f32.mrf.mxu0 }
  0xe9   : > { %v749_v31 = vmax.f32 %v551_v28, 0.0  ;;  %v566_v32 = vadd.f32 %v1918_v29, %v2206_v53  ;;  %1986 = vmatprep.mubr.msk.bf16.mxu1 %vm850_vm2, %v791_v27 }
  0xea   : > { %v560_v33 = vpop.f32.mrf.mxu0 }
  0xeb   : > { %v792_v34 = vpack.c.bf16 %v750_v30, %v749_v31  ;;  %v561_v35 = vadd.f32 %v2206_v53, %v560_v33  ;;  %v752_v37 = vmax.f32 %v566_v32, 0.0 }
  0xec   : > { %v1921_v36 = vpop.f32.mrf.mxu0 }
  0xed   : > { %v751_v38 = vmax.f32 %v561_v35, 0.0  ;;  %v576_v39 = vadd.f32 %v1921_v36, %v2206_v53  ;;  %1987 = vmatmul.mubr.msk.bf16.gmra.mxu1 %vm850_vm2, %v792_v34 }
  0xee   : > { %v570_v40 = vpop.f32.mrf.mxu0 }
  0xef   : > { %v793_v41 = vpack.c.bf16 %v752_v37, %v751_v38  ;;  %v571_v42 = vadd.f32 %v2206_v53, %v570_v40  ;;  %v754_v44 = vmax.f32 %v576_v39, 0.0 }
  0xf0   : > { %v1924_v43 = vpop.f32.mrf.mxu0 }
  0xf1   : > { %v753_v45 = vmax.f32 %v571_v42, 0.0  ;;  %v586_v46 = vadd.f32 %v1924_v43, %v2206_v53  ;;  %1990 = vmatprep.mubr.msk.bf16.mxu1 %vm850_vm2, %v793_v41 }
  0xf2   : > { %v580_v47 = vpop.f32.mrf.mxu0 }
  0xf3   : > { %v794_v48 = vpack.c.bf16 %v754_v44, %v753_v45  ;;  %v581_v49 = vadd.f32 %v2206_v53, %v580_v47  ;;  %v756_v51 = vmax.f32 %v586_v46, 0.0 }
  0xf4   : > { %v1927_v50 = vpop.f32.mrf.mxu0 }
  0xf5   : > { %v755_v52 = vmax.f32 %v581_v49, 0.0  ;;  %v596_v54 = vadd.f32 %v1927_v50, %v2206_v53  ;;  %1991 = vmatmul.mubr.msk.bf16.gmra.mxu1 %vm850_vm2, %v794_v48 }
  0xf6   : > { %v590_v55 = vpop.f32.mrf.mxu0 }
  0xf7   : > { %v795_v56 = vpack.c.bf16 %v756_v51, %v755_v52  ;;  %v591_v57 = vadd.f32 %v2206_v53, %v590_v55  ;;  %v758_v59 = vmax.f32 %v596_v54, 0.0 }
  0xf8   : > { %v1930_v58 = vpop.f32.mrf.mxu0 }
  0xf9   : > { %v757_v60 = vmax.f32 %v591_v57, 0.0  ;;  %v606_v61 = vadd.f32 %v1930_v58, %v2206_v53  ;;  %1994 = vmatprep.mubr.msk.bf16.mxu1 %vm850_vm2, %v795_v56 }
  0xfa   : > { %v600_v62 = vpop.f32.mrf.mxu0 }
  0xfb   : > { %v796_v63 = vpack.c.bf16 %v758_v59, %v757_v60  ;;  %v601_v0 = vadd.f32 %v2206_v53, %v600_v62  ;;  %v760_v2 = vmax.f32 %v606_v61, 0.0 }
  0xfc   : > { %v1933_v1 = vpop.f32.mrf.mxu0 }
  0xfd   : > { %v759_v3 = vmax.f32 %v601_v0, 0.0  ;;  %v616_v4 = vadd.f32 %v1933_v1, %v2206_v53  ;;  %1995 = vmatmul.mubr.msk.bf16.gmra.mxu1 %vm850_vm2, %v796_v63 }
  0xfe   : > { %v610_v5 = vpop.f32.mrf.mxu0 }
  0xff   : > { %v797_v6 = vpack.c.bf16 %v760_v2, %v759_v3  ;;  %v611_v7 = vadd.f32 %v2206_v53, %v610_v5  ;;  %v762_v9 = vmax.f32 %v616_v4, 0.0 }
 0x100   : > { %v1936_v8 = vpop.f32.mrf.mxu0 }
 0x101   : > { %v761_v10 = vmax.f32 %v611_v7, 0.0  ;;  %v626_v11 = vadd.f32 %v1936_v8, %v2206_v53  ;;  %1998 = vmatprep.mubr.msk.bf16.mxu1 %vm850_vm2, %v797_v6 }
 0x102   : > { %v620_v12 = vpop.f32.mrf.mxu0 }
 0x103   : > { %v798_v13 = vpack.c.bf16 %v762_v9, %v761_v10  ;;  %v621_v14 = vadd.f32 %v2206_v53, %v620_v12  ;;  %v764_v16 = vmax.f32 %v626_v11, 0.0 }
 0x104   : > { %v1939_v15 = vpop.f32.mrf.mxu0 }
 0x105   : > { %v763_v17 = vmax.f32 %v621_v14, 0.0  ;;  %v636_v18 = vadd.f32 %v1939_v15, %v2206_v53  ;;  %1999 = vmatmul.mubr.msk.bf16.gmra.mxu1 %vm850_vm2, %v798_v13 }
 0x106   : > { %v630_v19 = vpop.f32.mrf.mxu0 }
 0x107   : > { %v799_v20 = vpack.c.bf16 %v764_v16, %v763_v17  ;;  %v631_v21 = vadd.f32 %v2206_v53, %v630_v19  ;;  %v766_v23 = vmax.f32 %v636_v18, 0.0 }
 0x108   : > { %v1942_v22 = vpop.f32.mrf.mxu0 }
 0x109   : > { %v765_v24 = vmax.f32 %v631_v21, 0.0  ;;  %v646_v25 = vadd.f32 %v1942_v22, %v2206_v53  ;;  %2002 = vmatprep.mubr.msk.bf16.mxu1 %vm850_vm2, %v799_v20 }
 0x10a   : > { %v640_v26 = vpop.f32.mrf.mxu0 }
 0x10b   : > { %v800_v27 = vpack.c.bf16 %v766_v23, %v765_v24  ;;  %v641_v28 = vadd.f32 %v2206_v53, %v640_v26  ;;  %v768_v30 = vmax.f32 %v646_v25, 0.0 }
 0x10c   : > { %v1945_v29 = vpop.f32.mrf.mxu0 }
 0x10d   : > { %v767_v31 = vmax.f32 %v641_v28, 0.0  ;;  %v656_v32 = vadd.f32 %v1945_v29, %v2206_v53  ;;  %2003 = vmatmul.mubr.msk.bf16.gmra.mxu1 %vm850_vm2, %v800_v27 }
 0x10e   : > { %v650_v33 = vpop.f32.mrf.mxu0 }
 0x10f   : > { %v801_v34 = vpack.c.bf16 %v768_v30, %v767_v31  ;;  %v651_v35 = vadd.f32 %v2206_v53, %v650_v33  ;;  %v770_v37 = vmax.f32 %v656_v32, 0.0  ;;  %v2283_v33 = vld [vmem:[%s2370_s4] ss:$0 sm:$0xff] }
 0x110   : > { %v1948_v36 = vpop.f32.mrf.mxu0 }
 0x111   : > { %v769_v38 = vmax.f32 %v651_v35, 0.0  ;;  %v666_v39 = vadd.f32 %v1948_v36, %v2206_v53  ;;  %2006 = vmatprep.mubr.msk.bf16.mxu1 %vm850_vm2, %v801_v34 }
 0x112   : > { %v660_v40 = vpop.f32.mrf.mxu0 }
 0x113   : > { %v802_v41 = vpack.c.bf16 %v770_v37, %v769_v38  ;;  %v661_v42 = vadd.f32 %v2206_v53, %v660_v40  ;;  %v772_v44 = vmax.f32 %v666_v39, 0.0 }
 0x114   : > { %v1951_v43 = vpop.f32.mrf.mxu0 }
 0x115   : > { %v771_v45 = vmax.f32 %v661_v42, 0.0  ;;  %v676_v46 = vadd.f32 %v1951_v43, %v2206_v53  ;;  %2007 = vmatmul.mubr.msk.bf16.gmra.mxu1 %vm850_vm2, %v802_v41 }
 0x116   : > { %v670_v47 = vpop.f32.mrf.mxu0 }
 0x117   : > { %v803_v48 = vpack.c.bf16 %v772_v44, %v771_v45  ;;  %v671_v49 = vadd.f32 %v2206_v53, %v670_v47  ;;  %v774_v51 = vmax.f32 %v676_v46, 0.0 }
 0x118   : > { %v1954_v50 = vpop.f32.mrf.mxu0 }
 0x119   : > { %v773_v52 = vmax.f32 %v671_v49, 0.0  ;;  %v686_v54 = vadd.f32 %v1954_v50, %v2206_v53  ;;  %2010 = vmatprep.mubr.msk.bf16.mxu1 %vm850_vm2, %v803_v48 }
 0x11a   : > { %v680_v55 = vpop.f32.mrf.mxu0 }
 0x11b   : > { %v804_v56 = vpack.c.bf16 %v774_v51, %v773_v52  ;;  %v681_v57 = vadd.f32 %v2206_v53, %v680_v55  ;;  %v776_v59 = vmax.f32 %v686_v54, 0.0 }
 0x11c   : > { %v1957_v58 = vpop.f32.mrf.mxu0 }
 0x11d   : > { %v775_v60 = vmax.f32 %v681_v57, 0.0  ;;  %v696_v61 = vadd.f32 %v1957_v58, %v2206_v53  ;;  %2011 = vmatmul.mubr.msk.bf16.gmra.mxu1 %vm850_vm2, %v804_v56 }
 0x11e   : > { %v690_v62 = vpop.f32.mrf.mxu0 }
 0x11f   : > { %v805_v63 = vpack.c.bf16 %v776_v59, %v775_v60  ;;  %v691_v0 = vadd.f32 %v2206_v53, %v690_v62  ;;  %v778_v2 = vmax.f32 %v696_v61, 0.0 }
 0x120   : > { %v1960_v1 = vpop.f32.mrf.mxu0 }
 0x121   : > { %v777_v3 = vmax.f32 %v691_v0, 0.0  ;;  %v706_v4 = vadd.f32 %v1960_v1, %v2206_v53  ;;  %2014 = vmatprep.mubr.msk.bf16.mxu1 %vm850_vm2, %v805_v63 }
 0x122   : > { %v700_v5 = vpop.f32.mrf.mxu0 }
 0x123   : > { %v806_v6 = vpack.c.bf16 %v778_v2, %v777_v3  ;;  %v701_v7 = vadd.f32 %v2206_v53, %v700_v5  ;;  %v780_v9 = vmax.f32 %v706_v4, 0.0 }
 0x124   : > { %v1963_v8 = vpop.f32.mrf.mxu0 }
 0x125   : > { %v779_v10 = vmax.f32 %v701_v7, 0.0  ;;  %v716_v11 = vadd.f32 %v1963_v8, %v2206_v53  ;;  %2015 = vmatmul.mubr.msk.bf16.gmra.mxu1 %vm850_vm2, %v806_v6 }
 0x126   : > { %v710_v12 = vpop.f32.mrf.mxu0 }
 0x127   : > { %v807_v13 = vpack.c.bf16 %v780_v9, %v779_v10  ;;  %v711_v14 = vadd.f32 %v2206_v53, %v710_v12  ;;  %v782_v16 = vmax.f32 %v716_v11, 0.0 }
 0x128   : > { %v1966_v15 = vpop.f32.mrf.mxu0 }
 0x129   : > { %v781_v17 = vmax.f32 %v711_v14, 0.0  ;;  %v726_v18 = vadd.f32 %v1966_v15, %v2206_v53  ;;  %2018 = vmatprep.mubr.msk.bf16.mxu1 %vm850_vm2, %v807_v13 }
 0x12a   : > { %v720_v19 = vpop.f32.mrf.mxu0 }
 0x12b   : > { %v808_v20 = vpack.c.bf16 %v782_v16, %v781_v17  ;;  %v721_v21 = vadd.f32 %v2206_v53, %v720_v19  ;;  %v784_v23 = vmax.f32 %v726_v18, 0.0 }
 0x12c   : > { %v1969_v22 = vpop.f32.mrf.mxu0 }
 0x12d   : > { %v783_v24 = vmax.f32 %v721_v21, 0.0  ;;  %v736_v25 = vadd.f32 %v1969_v22, %v2206_v53  ;;  %2019 = vmatmul.mubr.msk.bf16.gmra.mxu1 %vm850_vm2, %v808_v20 }
 0x12e   : > { %v730_v26 = vpop.f32.mrf.mxu0 }
 0x12f   : > { %v809_v27 = vpack.c.bf16 %v784_v23, %v783_v24  ;;  %v731_v28 = vadd.f32 %v2206_v53, %v730_v26  ;;  %v786_v29 = vmax.f32 %v736_v25, 0.0 }
 0x131   : > { %v785_v30 = vmax.f32 %v731_v28, 0.0  ;;  %2022 = vmatprep.mubr.msk.bf16.mxu1 %vm850_vm2, %v809_v27 }
 0x133   : > { %v810_v31 = vpack.c.bf16 %v786_v29, %v785_v30 }
 0x135   : > { %2023 = vmatmul.mubr.msk.bf16.gmra.mxu1 %vm850_vm2, %v810_v31 }
 0x19d   : > { %v1980_v32 = vpop.f32.mrf.mxu1 }
 0x19e   : > { %v966_v35 = vadd.f32 %v1980_v32, %v2283_v33 }
 0x19f   : > { %v957_v34 = vpop.f32.mrf.mxu1 }
 0x1a0   : > { %v958_v37 = vadd.f32 %v2283_v33, %v957_v34  ;;  %v1150_v39 = vmax.f32 %v966_v35, 0.0 }
 0x1a1   : > { %v1981_v36 = vpop.f32.mrf.mxu1 }
 0x1a2   : > { %v969_v53 = vadd.f32 %v1981_v36, %v2283_v33  ;;  %v1148_v43 = vmax.f32 %v958_v37, 0.0 }
 0x1a3   : > { %v960_v38 = vpop.f32.mrf.mxu1 }
 0x1a4   : > { %v1151_v40 = vmax.f32 %v969_v53, 0.0  ;;  %v961_v41 = vadd.f32 %v2283_v33, %v960_v38 }
 0x1a5   : > { %v1984_v42 = vpop.f32.mrf.mxu1 }
 0x1a6   : > { %v1684_v44 = vpack.c.bf16 %v1151_v40, %v1150_v39  ;;  %v1149_v45 = vmax.f32 %v961_v41, 0.0  ;;  %v982_v48 = vadd.f32 %v1984_v42, %v2283_v33 }
 0x1a7   : > { %v973_v46 = vpop.f32.mrf.mxu1 }
 0x1a8   : > { %1796 = vst [vmem:[%s2293_s17 + $0x8] sm:$0xff] %v1684_v44   ;;  %v1679_v47 = vpack.c.bf16 %v1149_v45, %v1148_v43  ;;  %v974_v50 = vadd.f32 %v2283_v33, %v973_v46  ;;  %v1154_v54 = vmax.f32 %v982_v48, 0.0 }
 0x1a9   : > { %v1985_v49 = vpop.f32.mrf.mxu1 }
 0x1aa   : > { %1680 = vst [vmem:[%s2293_s17] sm:$0xff] %v1679_v47   ;;  %v985_v51 = vadd.f32 %v1985_v49, %v2283_v33  ;;  %v1152_v58 = vmax.f32 %v974_v50, 0.0 }
 0x1ab   : > { %v976_v52 = vpop.f32.mrf.mxu1 }
 0x1ac   : > { %v1155_v55 = vmax.f32 %v985_v51, 0.0  ;;  %v977_v56 = vadd.f32 %v2283_v33, %v976_v52 }
 0x1ad   : > { %v1988_v57 = vpop.f32.mrf.mxu1 }
 0x1ae   : > { %v1694_v59 = vpack.c.bf16 %v1155_v55, %v1154_v54  ;;  %v1153_v60 = vmax.f32 %v977_v56, 0.0  ;;  %v998_v63 = vadd.f32 %v1988_v57, %v2283_v33 }
 0x1af   : > { %v989_v61 = vpop.f32.mrf.mxu1 }
 0x1b0   : > { %1798 = vst [vmem:[%s2293_s17 + $0x18] sm:$0xff] %v1694_v59   ;;  %v1689_v62 = vpack.c.bf16 %v1153_v60, %v1152_v58  ;;  %v990_v1 = vadd.f32 %v2283_v33, %v989_v61  ;;  %v1158_v4 = vmax.f32 %v998_v63, 0.0 }
 0x1b1   : > { %v1989_v0 = vpop.f32.mrf.mxu1 }
 0x1b2   : > { %1797 = vst [vmem:[%s2293_s17 + $0x10] sm:$0xff] %v1689_v62   ;;  %v1001_v2 = vadd.f32 %v1989_v0, %v2283_v33  ;;  %v1156_v8 = vmax.f32 %v990_v1, 0.0 }
 0x1b3   : > { %v992_v3 = vpop.f32.mrf.mxu1 }
 0x1b4   : > { %v1159_v5 = vmax.f32 %v1001_v2, 0.0  ;;  %v993_v6 = vadd.f32 %v2283_v33, %v992_v3 }
 0x1b5   : > { %v1992_v7 = vpop.f32.mrf.mxu1 }
 0x1b6   : > { %v1704_v9 = vpack.c.bf16 %v1159_v5, %v1158_v4  ;;  %v1157_v10 = vmax.f32 %v993_v6, 0.0  ;;  %v1014_v13 = vadd.f32 %v1992_v7, %v2283_v33 }
 0x1b7   : > { %v1005_v11 = vpop.f32.mrf.mxu1 }
 0x1b8   : > { %1800 = vst [vmem:[%s2293_s17 + $0x28] sm:$0xff] %v1704_v9   ;;  %v1699_v12 = vpack.c.bf16 %v1157_v10, %v1156_v8  ;;  %v1006_v15 = vadd.f32 %v2283_v33, %v1005_v11  ;;  %v1162_v18 = vmax.f32 %v1014_v13, 0.0 }
 0x1b9   : > { %v1993_v14 = vpop.f32.mrf.mxu1 }
 0x1ba   : > { %1799 = vst [vmem:[%s2293_s17 + $0x20] sm:$0xff] %v1699_v12   ;;  %v1017_v16 = vadd.f32 %v1993_v14, %v2283_v33  ;;  %v1160_v22 = vmax.f32 %v1006_v15, 0.0 }
 0x1bb   : > { %v1008_v17 = vpop.f32.mrf.mxu1 }
 0x1bc   : > { %v1163_v19 = vmax.f32 %v1017_v16, 0.0  ;;  %v1009_v20 = vadd.f32 %v2283_v33, %v1008_v17 }
 0x1bd   : > { %v1996_v21 = vpop.f32.mrf.mxu1 }
 0x1be   : > { %v1714_v23 = vpack.c.bf16 %v1163_v19, %v1162_v18  ;;  %v1161_v24 = vmax.f32 %v1009_v20, 0.0  ;;  %v1030_v27 = vadd.f32 %v1996_v21, %v2283_v33 }
 0x1bf   : > { %v1021_v25 = vpop.f32.mrf.mxu1 }
 0x1c0   : > { %1802 = vst [vmem:[%s2293_s17 + $0x38] sm:$0xff] %v1714_v23   ;;  %v1709_v26 = vpack.c.bf16 %v1161_v24, %v1160_v22  ;;  %v1022_v29 = vadd.f32 %v2283_v33, %v1021_v25  ;;  %v1166_v32 = vmax.f32 %v1030_v27, 0.0 }
 0x1c1   : > { %v1997_v28 = vpop.f32.mrf.mxu1 }
 0x1c2   : > { %1801 = vst [vmem:[%s2293_s17 + $0x30] sm:$0xff] %v1709_v26   ;;  %v1033_v30 = vadd.f32 %v1997_v28, %v2283_v33  ;;  %v1164_v37 = vmax.f32 %v1022_v29, 0.0 }
 0x1c3   : > { %v1024_v31 = vpop.f32.mrf.mxu1 }
 0x1c4   : > { %v1167_v34 = vmax.f32 %v1033_v30, 0.0  ;;  %v1025_v35 = vadd.f32 %v2283_v33, %v1024_v31 }
 0x1c5   : > { %v2000_v36 = vpop.f32.mrf.mxu1 }
 0x1c6   : > { %v1724_v53 = vpack.c.bf16 %v1167_v34, %v1166_v32  ;;  %v1165_v38 = vmax.f32 %v1025_v35, 0.0  ;;  %v1046_v41 = vadd.f32 %v2000_v36, %v2283_v33 }
 0x1c7   : > { %v1037_v39 = vpop.f32.mrf.mxu1 }
 0x1c8   : > { %1804 = vst [vmem:[%s2293_s17 + $0x48] sm:$0xff] %v1724_v53   ;;  %v1719_v40 = vpack.c.bf16 %v1165_v38, %v1164_v37  ;;  %v1038_v43 = vadd.f32 %v2283_v33, %v1037_v39  ;;  %v1170_v46 = vmax.f32 %v1046_v41, 0.0 }
 0x1c9   : > { %v2001_v42 = vpop.f32.mrf.mxu1 }
 0x1ca   : > { %1803 = vst [vmem:[%s2293_s17 + $0x40] sm:$0xff] %v1719_v40   ;;  %v1049_v44 = vadd.f32 %v2001_v42, %v2283_v33  ;;  %v1168_v50 = vmax.f32 %v1038_v43, 0.0 }
 0x1cb   : > { %v1040_v45 = vpop.f32.mrf.mxu1 }
 0x1cc   : > { %v1171_v47 = vmax.f32 %v1049_v44, 0.0  ;;  %v1041_v48 = vadd.f32 %v2283_v33, %v1040_v45 }
 0x1cd   : > { %v2004_v49 = vpop.f32.mrf.mxu1 }
 0x1ce   : > { %v1734_v51 = vpack.c.bf16 %v1171_v47, %v1170_v46  ;;  %v1169_v52 = vmax.f32 %v1041_v48, 0.0  ;;  %v1062_v56 = vadd.f32 %v2004_v49, %v2283_v33 }
 0x1cf   : > { %v1053_v54 = vpop.f32.mrf.mxu1 }
 0x1d0   : > { %1806 = vst [vmem:[%s2293_s17 + $0x58] sm:$0xff] %v1734_v51   ;;  %v1729_v55 = vpack.c.bf16 %v1169_v52, %v1168_v50  ;;  %v1054_v58 = vadd.f32 %v2283_v33, %v1053_v54  ;;  %v1174_v61 = vmax.f32 %v1062_v56, 0.0 }
 0x1d1   : > { %v2005_v57 = vpop.f32.mrf.mxu1 }
 0x1d2   : > { %1805 = vst [vmem:[%s2293_s17 + $0x50] sm:$0xff] %v1729_v55   ;;  %v1065_v59 = vadd.f32 %v2005_v57, %v2283_v33  ;;  %v1172_v1 = vmax.f32 %v1054_v58, 0.0 }
 0x1d3   : > { %v1056_v60 = vpop.f32.mrf.mxu1 }
 0x1d4   : > { %v1175_v62 = vmax.f32 %v1065_v59, 0.0  ;;  %v1057_v63 = vadd.f32 %v2283_v33, %v1056_v60 }
 0x1d5   : > { %v2008_v0 = vpop.f32.mrf.mxu1 }
 0x1d6   : > { %v1744_v2 = vpack.c.bf16 %v1175_v62, %v1174_v61  ;;  %v1173_v3 = vmax.f32 %v1057_v63, 0.0  ;;  %v1078_v6 = vadd.f32 %v2008_v0, %v2283_v33 }
 0x1d7   : > { %v1069_v4 = vpop.f32.mrf.mxu1 }
 0x1d8   : > { %1808 = vst [vmem:[%s2293_s17 + $0x68] sm:$0xff] %v1744_v2   ;;  %v1739_v5 = vpack.c.bf16 %v1173_v3, %v1172_v1  ;;  %v1070_v8 = vadd.f32 %v2283_v33, %v1069_v4  ;;  %v1178_v11 = vmax.f32 %v1078_v6, 0.0 }
 0x1d9   : > { %v2009_v7 = vpop.f32.mrf.mxu1 }
 0x1da   : > { %1807 = vst [vmem:[%s2293_s17 + $0x60] sm:$0xff] %v1739_v5   ;;  %v1081_v9 = vadd.f32 %v2009_v7, %v2283_v33  ;;  %v1176_v15 = vmax.f32 %v1070_v8, 0.0 }
 0x1db   : > { %v1072_v10 = vpop.f32.mrf.mxu1 }
 0x1dc   : > { %v1179_v12 = vmax.f32 %v1081_v9, 0.0  ;;  %v1073_v13 = vadd.f32 %v2283_v33, %v1072_v10 }
 0x1dd   : > { %v2012_v14 = vpop.f32.mrf.mxu1 }
 0x1de   : > { %v1754_v16 = vpack.c.bf16 %v1179_v12, %v1178_v11  ;;  %v1177_v17 = vmax.f32 %v1073_v13, 0.0  ;;  %v1094_v20 = vadd.f32 %v2012_v14, %v2283_v33 }
 0x1df   : > { %v1085_v18 = vpop.f32.mrf.mxu1 }
 0x1e0   : > { %1810 = vst [vmem:[%s2293_s17 + $0x78] sm:$0xff] %v1754_v16   ;;  %v1749_v19 = vpack.c.bf16 %v1177_v17, %v1176_v15  ;;  %v1086_v22 = vadd.f32 %v2283_v33, %v1085_v18  ;;  %v1182_v25 = vmax.f32 %v1094_v20, 0.0 }
 0x1e1   : > { %v2013_v21 = vpop.f32.mrf.mxu1 }
 0x1e2   : > { %1809 = vst [vmem:[%s2293_s17 + $0x70] sm:$0xff] %v1749_v19   ;;  %v1097_v23 = vadd.f32 %v2013_v21, %v2283_v33  ;;  %v1180_v29 = vmax.f32 %v1086_v22, 0.0 }
 0x1e3   : > { %v1088_v24 = vpop.f32.mrf.mxu1 }
 0x1e4   : > { %v1183_v26 = vmax.f32 %v1097_v23, 0.0  ;;  %v1089_v27 = vadd.f32 %v2283_v33, %v1088_v24 }
 0x1e5   : > { %v2016_v28 = vpop.f32.mrf.mxu1 }
 0x1e6   : > { %v1764_v30 = vpack.c.bf16 %v1183_v26, %v1182_v25  ;;  %v1181_v31 = vmax.f32 %v1089_v27, 0.0  ;;  %v1110_v35 = vadd.f32 %v2016_v28, %v2283_v33 }
 0x1e7   : > { %v1101_v32 = vpop.f32.mrf.mxu1 }
 0x1e8   : > { %1812 = vst [vmem:[%s2293_s17 + $0x88] sm:$0xff] %v1764_v30   ;;  %v1759_v34 = vpack.c.bf16 %v1181_v31, %v1180_v29  ;;  %v1102_v37 = vadd.f32 %v2283_v33, %v1101_v32  ;;  %v1186_v39 = vmax.f32 %v1110_v35, 0.0 }
 0x1e9   : > { %v2017_v36 = vpop.f32.mrf.mxu1 }
 0x1ea   : > { %1811 = vst [vmem:[%s2293_s17 + $0x80] sm:$0xff] %v1759_v34   ;;  %v1113_v53 = vadd.f32 %v2017_v36, %v2283_v33  ;;  %v1184_v43 = vmax.f32 %v1102_v37, 0.0 }
 0x1eb   : > { %v1104_v38 = vpop.f32.mrf.mxu1 }
 0x1ec   : > { %v1187_v40 = vmax.f32 %v1113_v53, 0.0  ;;  %v1105_v41 = vadd.f32 %v2283_v33, %v1104_v38 }
 0x1ed   : > { %v2020_v42 = vpop.f32.mrf.mxu1 }
 0x1ee   : > { %v1774_v44 = vpack.c.bf16 %v1187_v40, %v1186_v39  ;;  %v1185_v45 = vmax.f32 %v1105_v41, 0.0  ;;  %v1126_v48 = vadd.f32 %v2020_v42, %v2283_v33 }
 0x1ef   : > { %v1117_v46 = vpop.f32.mrf.mxu1 }
 0x1f0   : > { %1814 = vst [vmem:[%s2293_s17 + $0x98] sm:$0xff] %v1774_v44   ;;  %v1769_v47 = vpack.c.bf16 %v1185_v45, %v1184_v43  ;;  %v1118_v50 = vadd.f32 %v2283_v33, %v1117_v46  ;;  %v1190_v54 = vmax.f32 %v1126_v48, 0.0 }
 0x1f1   : > { %v2021_v49 = vpop.f32.mrf.mxu1 }
 0x1f2   : > { %1813 = vst [vmem:[%s2293_s17 + $0x90] sm:$0xff] %v1769_v47   ;;  %v1129_v51 = vadd.f32 %v2021_v49, %v2283_v33  ;;  %v1188_v58 = vmax.f32 %v1118_v50, 0.0 }
 0x1f3   : > { %v1120_v52 = vpop.f32.mrf.mxu1 }
 0x1f4   : > { %v1191_v55 = vmax.f32 %v1129_v51, 0.0  ;;  %v1121_v56 = vadd.f32 %v2283_v33, %v1120_v52 }
 0x1f5   : > { %v2024_v57 = vpop.f32.mrf.mxu1 }
 0x1f6   : > { %v1784_v59 = vpack.c.bf16 %v1191_v55, %v1190_v54  ;;  %v1189_v60 = vmax.f32 %v1121_v56, 0.0  ;;  %v1142_v63 = vadd.f32 %v2024_v57, %v2283_v33 }
 0x1f7   : > { %v1133_v61 = vpop.f32.mrf.mxu1 }
 0x1f8   : > { %1816 = vst [vmem:[%s2293_s17 + $0xa8] sm:$0xff] %v1784_v59   ;;  %v1779_v62 = vpack.c.bf16 %v1189_v60, %v1188_v58  ;;  %v1134_v1 = vadd.f32 %v2283_v33, %v1133_v61  ;;  %v1194_v4 = vmax.f32 %v1142_v63, 0.0 }
 0x1f9   : > { %v2025_v0 = vpop.f32.mrf.mxu1 }
 0x1fa   : > { %1815 = vst [vmem:[%s2293_s17 + $0xa0] sm:$0xff] %v1779_v62   ;;  %v1145_v2 = vadd.f32 %v2025_v0, %v2283_v33  ;;  %v1192_v7 = vmax.f32 %v1134_v1, 0.0 }
 0x1fb   : > { %v1136_v3 = vpop.f32.mrf.mxu1 }
 0x1fc   : > { %v1195_v5 = vmax.f32 %v1145_v2, 0.0  ;;  %v1137_v6 = vadd.f32 %v2283_v33, %v1136_v3 }
 0x1fe   : > { %v1794_v8 = vpack.c.bf16 %v1195_v5, %v1194_v4  ;;  %v1193_v9 = vmax.f32 %v1137_v6, 0.0 }
 0x200   : > { %1818 = vst [vmem:[%s2293_s17 + $0xb8] sm:$0xff] %v1794_v8   ;;  %v1789_v10 = vpack.c.bf16 %v1193_v9, %v1192_v7 }
 0x202   : > { %1817 = vst [vmem:[%s2293_s17 + $0xb0] sm:$0xff] %v1789_v10  }
 0x203 PF: > { %s15_s18 = sadd.s32 1, %s2044_s18  }
 0x204   : > { %p12_p4 = scmp.ge.s32.totalorder %s15_s18, 4  }
 0x206   :  { %14 = sbr.rel (!%p12_p4) target bundleno = 1 (0x1), region = 70 }

// kernel: tun_bone_forward.3
= control target key start
LH: loop header
LB: loop body
LE: loop exit
PB: predicated region body
PF: predicated region fallthrough
CT: control target
= control target key end

     0   :  { %s588_s17 = smov 0   ;;  %s590_s18 = smov 0   ;;  %s648_s0 = inlined_call_operand.vmem [shape: bf16[3,64,128], index: 0, kind: input, shape index: {}]   ;;  %s649_s1 = inlined_call_operand.vmem [shape: bf16[64,128], index: 1, kind: input, shape index: {}]   ;;  %s650_s2 = inlined_call_operand.vmem [shape: f32[1,128], index: 2, kind: input, shape index: {}]   ;;  %s651_s3 = inlined_call_operand.<no memory space> [shape: f32[1,1], index: 3, kind: input, shape index: {}]   ;;  %s652_s4 = inlined_call_operand.vmem [shape: f32[3,64,1], index: 4, kind: output, shape index: {}]  }
   0x1   :  { %v9_v0 = vstv %s651_s3  ;;  %s592_s19 = smov 0  }
   0x2   :  { %10 = vst [vmem:[#allocation2] sm:$0x1] %v9_v0 }
   0x3 LB: > { %s28_s3 = sadd.s32 1, %s554_s18  ;;  %p463_p0 = scmp.ge.s32.totalorder %s558_s19, 1  ;;  %s558_s19 = sphi %s592_s19, %s16_s19   ;;  %s554_s18 = sphi %s590_s18, %s654_s18   ;;  %s550_s17 = sphi %s588_s17, %s653_s17  }
   0x4   : > { %p30_p1 = scmp.ge.s32.totalorder %s28_s3, 3  ;;  %p196_p2 = scmp.lt.s32.totalorder %s558_s19, 4 }
   0x6   : > { %s656_s3 = smov (%p30_p1, %s28_s3), 0  ;;  %p197_p3 = pnand %p463_p0, %p196_p2 }
   0x7   : > { %p236_p4 = scmp.lt.s32.totalorder (!%p197_p3), %s550_s17, 2 }
   0x8   : > { %200 = sbr.rel (%p197_p3) target bundleno = 176 (0xb0), region = 36 }
   0xd   : > { %s658_s17 = smov (!%p236_p4, %s550_s17), 2  ;;  %v509_v1 = vld [vmem:[%s649_s1 + $0x8] sm:$0xff]   ;;  %v491_v2 = vld [vmem:[%s649_s1] sm:$0xff]   ;;  %v510_v7 = vld [vmem:[%s649_s1 + $0x10] sm:$0xff]   ;;  %vm347_vm0 = vcmask 7168  }
   0xe   : > { %s472_s24 = sshll.u32 %s658_s17, 5  ;;  %v496_v3 = vunpack.c.l.bf16 %v509_v1  ;;  %v492_v4 = vunpack.c.l.bf16 %v491_v2  ;;  %v497_v5 = vunpack.c.h.bf16 %v509_v1  ;;  %v493_v6 = vunpack.c.h.bf16 %v491_v2  ;;  %v468_v15 = vld [vmem:[%s650_s2] ss:$0 sm:$0xff]  ;;  %v511_v25 = vld [vmem:[%s649_s1 + $0x18] sm:$0xff]   ;;  %s473_s8 = sshll.u32 %s658_s17, 6 }
   0xf   : > { %s243_s27 = scalar_lea.vmem %s648_s0, %s472_s24  ;;  %v501_v17 = vunpack.c.h.bf16 %v510_v7  ;;  %v500_v19 = vunpack.c.l.bf16 %v510_v7  ;;  %v505_v30 = vunpack.c.h.bf16 %v511_v25  ;;  %v504_v31 = vunpack.c.l.bf16 %v511_v25  ;;  %v469_v42 = vld [vmem:[#allocation2] ss:$0 sm:$0xff]  ;;  %s259_s11 = scalar_lea.vmem %s652_s4, %s473_s8 }
  0x10   : > { %v506_v8 = vld [vmem:[%s243_s27 + $0x8] sm:$0xff]   ;;  %v475_v9 = vld [vmem:[%s243_s27] sm:$0xff]   ;;  %v507_v10 = vld [vmem:[%s243_s27 + $0x10] sm:$0xff]  }
  0x11   : > { %v480_v11 = vunpack.c.l.bf16 %v506_v8  ;;  %v476_v12 = vunpack.c.l.bf16 %v475_v9  ;;  %v481_v13 = vunpack.c.h.bf16 %v506_v8  ;;  %v477_v14 = vunpack.c.h.bf16 %v475_v9  ;;  %v508_v24 = vld [vmem:[%s243_s27 + $0x18] sm:$0xff]  }
  0x12   : > { %v485_v16 = vunpack.c.h.bf16 %v507_v10  ;;  %v484_v18 = vunpack.c.l.bf16 %v507_v10  ;;  %v489_v29 = vunpack.c.h.bf16 %v508_v24  ;;  %v488_v35 = vunpack.c.l.bf16 %v508_v24 }
  0x13   : > { %v295_v20 = vadd.f32 %v496_v3, %v480_v11  ;;  %v293_v21 = vadd.f32 %v492_v4, %v476_v12  ;;  %v296_v22 = vadd.f32 %v497_v5, %v481_v13  ;;  %v294_v23 = vadd.f32 %v493_v6, %v477_v14 }
  0x14   : > { %v298_v28 = vadd.f32 %v501_v17, %v485_v16  ;;  %v297_v34 = vadd.f32 %v500_v19, %v484_v18  ;;  %v300_v36 = vadd.f32 %v505_v30, %v489_v29  ;;  %v299_v39 = vadd.f32 %v504_v31, %v488_v35 }
  0x15   : > { %v310_v26 = vmul.f32 %v468_v15, %v295_v20  ;;  %v308_v27 = vmul.f32 %v468_v15, %v293_v21  ;;  %v311_v32 = vmul.f32 %v468_v15, %v296_v22  ;;  %v309_v33 = vmul.f32 %v468_v15, %v294_v23 }
  0x16   : > { %v313_v37 = vmul.f32 %v468_v15, %v298_v28  ;;  %v312_v38 = vmul.f32 %v468_v15, %v297_v34  ;;  %v315_v40 = vmul.f32 %v468_v15, %v300_v36  ;;  %v314_v41 = vmul.f32 %v468_v15, %v299_v39 }
  0x17   : > { %320 = vadd.xlane.f32.xlu1 %v310_v26  ;;  %316 = vadd.xlane.f32.xlu0 %v308_v27 }
  0x1b   : > { %322 = vadd.xlane.f32.xlu1 %v311_v32  ;;  %318 = vadd.xlane.f32.xlu0 %v309_v33 }
  0x1f   : > { %326 = vadd.xlane.f32.xlu1 %v313_v37  ;;  %324 = vadd.xlane.f32.xlu0 %v312_v38 }
  0x23   : > { %330 = vadd.xlane.f32.xlu1 %v315_v40  ;;  %328 = vadd.xlane.f32.xlu0 %v314_v41 }
  0xa0   : > { %v321_v43 = vpop.xlane.xlu1 %320  ;;  %v317_v44 = vpop.xlane.xlu0 %316 }
  0xa1   : > { %v341_v45 = vadd.f32 %v469_v42, %v321_v43  ;;  %v339_v46 = vadd.f32 %v469_v42, %v317_v44 }
  0xa3   : > { %350 = vst.msk [vmem:[%s259_s11 + $0x10] sm:$0xff] %vm347_vm0, %v341_v45  ;;  %348 = vst.msk [vmem:[%s259_s11] sm:$0xff] %vm347_vm0, %v339_v46 }
  0xa4   : > { %v323_v47 = vpop.xlane.xlu1 %322  ;;  %v319_v48 = vpop.xlane.xlu0 %318 }
  0xa5   : > { %v342_v49 = vadd.f32 %v469_v42, %v323_v47  ;;  %v340_v50 = vadd.f32 %v469_v42, %v319_v48 }
  0xa7   : > { %351 = vst.msk [vmem:[%s259_s11 + $0x18] sm:$0xff] %vm347_vm0, %v342_v49  ;;  %349 = vst.msk [vmem:[%s259_s11 + $0x8] sm:$0xff] %vm347_vm0, %v340_v50 }
  0xa8   : > { %v327_v51 = vpop.xlane.xlu1 %326  ;;  %v325_v52 = vpop.xlane.xlu0 %324 }
  0xa9   : > { %v344_v53 = vadd.f32 %v469_v42, %v327_v51  ;;  %v343_v54 = vadd.f32 %v469_v42, %v325_v52 }
  0xab   : > { %353 = vst.msk [vmem:[%s259_s11 + $0x28] sm:$0xff] %vm347_vm0, %v344_v53  ;;  %352 = vst.msk [vmem:[%s259_s11 + $0x20] sm:$0xff] %vm347_vm0, %v343_v54 }
  0xac   : > { %v331_v55 = vpop.xlane.xlu1 %330  ;;  %v329_v56 = vpop.xlane.xlu0 %328 }
  0xad   : > { %v346_v57 = vadd.f32 %v469_v42, %v331_v55  ;;  %v345_v58 = vadd.f32 %v469_v42, %v329_v56 }
  0xaf   : > { %355 = vst.msk [vmem:[%s259_s11 + $0x38] sm:$0xff] %vm347_vm0, %v346_v57  ;;  %354 = vst.msk [vmem:[%s259_s11 + $0x30] sm:$0xff] %vm347_vm0, %v345_v58 }
  0xb0 PF: > { %s16_s19 = sadd.s32 1, %s558_s19   ;;  %s653_s17 = smov %s554_s18 }
  0xb1   : > { %p13_p5 = scmp.ge.s32.totalorder %s16_s19, 5   ;;  %s654_s18 = smov %s656_s3 }
  0xb3   :  { %15 = sbr.rel (!%p13_p5) target bundleno = 3 (0x3), region = 69 }

</bundles_post_ra>
